<compile_context>
chip_gen: v5e
topology: v5e:2x2
jax: 0.10.0
libtpu: 0.0.40
codegen_flags: <defaults>
</compile_context>

<pallas_src>
import functools

import jax
import jax.numpy as jnp
from jax.experimental import pallas as pl
from jax.experimental.pallas import tpu as pltpu

LN_EPS = 1e-5            # nn.LayerNorm default
BN_EPS = 2e-5            # nn.BatchNorm1d(eps=2e-05)


def _vmem_and_rows():
    """Derive a VMEM budget and a max batch-tile row count from the chip."""
    default_cap = 64 * 1024 * 1024
    try:
        info = pltpu.get_tpu_info()
        cap = int(getattr(info, "vmem_capacity_bytes", default_cap))
    except Exception:
        cap = default_cap
    vmem_limit = min(int(cap * 0.78), 100 * 1024 * 1024)
    max_rows = 2048 if cap >= (100 << 20) else 1024
    return vmem_limit, max_rows


VMEM_LIMIT, MAX_ROWS = _vmem_and_rows()


def _layernorm(x, g, b):
    mu = jnp.mean(x, axis=-1, keepdims=True)
    var = jnp.mean((x - mu) ** 2, axis=-1, keepdims=True)
    return (x - mu) * jax.lax.rsqrt(var + LN_EPS) * g + b


# ---------------------------------------------------------------------------
# Patch embedding kernel: patches @ W + b + pos_embed   (own small pallas_call)
# ---------------------------------------------------------------------------
def patch_embed_kernel(Bt, L, patches_ref, pw_ref, pb_ref, pos_ref, out_ref):
    D = out_ref.shape[-1]
    proj = jnp.dot(patches_ref[...], pw_ref[...],
                   preferred_element_type=jnp.float32) + pb_ref[...]
    proj = proj.reshape(Bt, L, D) + pos_ref[...][None, :, :]
    out_ref[...] = proj.reshape(Bt * L, D)


# ---------------------------------------------------------------------------
# Fused transformer blocks + final LayerNorm
# grid = (batch_tiles, depth); activation slab resident in f32 VMEM scratch.
# ---------------------------------------------------------------------------
def vit_blocks_kernel(num_heads, Bt, L, mlp_chunk,
                      x0_ref, vecs_ref, qkvw_ref, projw_ref,
                      fc1w_ref, fc1b_ref, fc2w_ref,
                      normg_ref, normb_ref,
                      out_ref, x_scr):
    d = pl.program_id(1)
    nd = pl.num_programs(1)
    rows, D = x_scr.shape
    H = num_heads
    hd = D // H
    scale = hd ** (-0.5)
    bf16 = jnp.bfloat16

    # ---- layer 0: seed the resident activation slab --------------------------
    @pl.when(d == 0)
    def _():
        x_scr[...] = x0_ref[...]

    x = x_scr[...]                                           # (rows, D) f32

    # packed per-layer vectors: [ln1_g, ln1_b, proj_b, ln2_g, ln2_b, fc2_b, 0, 0]
    vec = vecs_ref[0]                                        # (8, D) f32
    ln1_g, ln1_b = vec[0:1], vec[1:2]
    proj_b = vec[2:3]
    ln2_g, ln2_b = vec[3:4], vec[4:5]
    fc2_b = vec[5:6]

    # ---- attention branch: x + proj(MHSA(LN1(x))) ----------------------------
    xn = _layernorm(x, ln1_g, ln1_b)
    qkv = jnp.dot(xn.astype(bf16), qkvw_ref[0],
                  preferred_element_type=jnp.float32)        # (rows, 3D) f32
    # fold 1/sqrt(hd) into q; cast once to bf16 so the f32 qkv temp dies here
    q = (qkv[:, 0 * D:1 * D] * scale).astype(bf16).reshape(Bt, L, D)
    k = qkv[:, 1 * D:2 * D].astype(bf16).reshape(Bt, L, D)
    v = qkv[:, 2 * D:3 * D].astype(bf16).reshape(Bt, L, D)

    heads = []
    for h in range(H):                  # batched over Bt via 3-D einsums (MXU)
        sl = slice(h * hd, (h + 1) * hd)
        s = jnp.einsum('bqd,bkd->bqk', q[:, :, sl], k[:, :, sl],
                       preferred_element_type=jnp.float32)
        s = s - jnp.max(s, axis=-1, keepdims=True)
        p = jnp.exp(s)
        p = p * pl.reciprocal(jnp.sum(p, axis=-1, keepdims=True), approx=True)
        heads.append(jnp.einsum('bqk,bkd->bqd', p.astype(bf16), v[:, :, sl],
                                preferred_element_type=jnp.float32))
    attn = jnp.concatenate(heads, axis=-1).reshape(rows, D)  # lane-dense
    attn = jnp.dot(attn.astype(bf16), projw_ref[0],
                   preferred_element_type=jnp.float32) + proj_b
    x = x + attn

    # ---- MLP branch: x + fc2(relu6(fc1(LN2(x)))), Dh streamed in chunks ------
    xn2 = _layernorm(x, ln2_g, ln2_b).astype(bf16)
    Dh = fc1w_ref.shape[-1]
    acc = jnp.zeros((rows, D), jnp.float32)
    for c in range(Dh // mlp_chunk):
        csl = slice(c * mlp_chunk, (c + 1) * mlp_chunk)
        h1 = (jnp.dot(xn2, fc1w_ref[0][:, csl],
                      preferred_element_type=jnp.float32)
              + fc1b_ref[0][:, csl])
        h1 = jnp.clip(h1, 0.0, 6.0)                          # ReLU6
        acc = acc + jnp.dot(h1.astype(bf16), fc2w_ref[0][csl, :],
                            preferred_element_type=jnp.float32)
    x = x + acc + fc2_b

    # ---- carry + final LayerNorm (bf16 output written only once) ------------
    x_scr[...] = x

    @pl.when(d == nd - 1)
    def _():
        out_ref[...] = _layernorm(x, normg_ref[...], normb_ref[...]).astype(out_ref.dtype)


# ---------------------------------------------------------------------------
# Feature head: Linear(no bias) + BN(eval) + Linear(no bias) + BN(eval)
# feat_w1 streamed along K with a VMEM f32 accumulator.
# ---------------------------------------------------------------------------
def head_kernel(xf_ref, w1_ref, bn1m_ref, bn1v_ref, bn1g_ref, bn1b_ref,
                w2_ref, bn2m_ref, bn2v_ref, bn2g_ref, bn2b_ref,
                out_ref, acc_ref):
    k = pl.program_id(0)

    @pl.when(k == 0)
    def _():
        acc_ref[...] = jnp.zeros_like(acc_ref)

    acc_ref[...] += jnp.dot(xf_ref[...], w1_ref[...],
                            preferred_element_type=jnp.float32)

    @pl.when(k == pl.num_programs(0) - 1)
    def _():
        h1 = acc_ref[...]
        h1 = ((h1 - bn1m_ref[...]) * jax.lax.rsqrt(bn1v_ref[...] + BN_EPS)
              * bn1g_ref[...] + bn1b_ref[...])
        h2 = jnp.dot(h1.astype(jnp.bfloat16), w2_ref[...],
                     preferred_element_type=jnp.float32)
        out_ref[...] = ((h2 - bn2m_ref[...]) * jax.lax.rsqrt(bn2v_ref[...] + BN_EPS)
                        * bn2g_ref[...] + bn2b_ref[...])


# ---------------------------------------------------------------------------
# Tiling helpers
# ---------------------------------------------------------------------------
def _choose_batch_block(B, L, max_rows):
    valid = [c for c in range(1, B + 1)
             if B % c == 0 and c * L <= max_rows
             and ((c * L) % 8 == 0 or c == B)]
    if not valid:
        return B
    best = max(valid)
    # prefer >= 2 batch tiles (both v7x TensorCores busy) if tiles stay large
    multi = [c for c in valid if c < B and c * L >= 512]
    if best == B and multi:
        best = max(multi)
    return best


def _choose_mlp_chunk(Dh, target=1024):
    if Dh <= target:
        return Dh
    for mult in (256, 128):
        best = None
        for c in range(mult, target + 1, mult):
            if Dh % c == 0:
                best = c
        if best is not None:
            return best
    return Dh


# ---------------------------------------------------------------------------
# Wrappers
# ---------------------------------------------------------------------------
def run_patch_embed(patches_bf16, params, cfg, *, B, L, bb):
    D = cfg["dim"]
    Cpp = patches_bf16.shape[1]
    nb = B // bb
    kernel = functools.partial(patch_embed_kernel, bb, L)
    return pl.pallas_call(
        kernel,
        out_shape=jax.ShapeDtypeStruct((B * L, D), jnp.float32),
        grid=(nb,),
        in_specs=[
            pl.BlockSpec((bb * L, Cpp), lambda i: (i, 0)),   # patches
            pl.BlockSpec((Cpp, D), lambda i: (0, 0)),        # patch_w
            pl.BlockSpec((1, D), lambda i: (0, 0)),          # patch_b
            pl.BlockSpec((L, D), lambda i: (0, 0)),          # pos_embed
        ],
        out_specs=pl.BlockSpec((bb * L, D), lambda i: (i, 0)),
        compiler_params=pltpu.CompilerParams(
            dimension_semantics=("parallel",),
            vmem_limit_bytes=VMEM_LIMIT),
    )(patches_bf16, params["patch_w"].astype(jnp.bfloat16),
      params["patch_b"], params["pos_embed"])


def run_vit_blocks(x0_f32, params, cfg, *, B, L, bb):
    D = cfg["dim"]
    depth = cfg["depth"]
    H = cfg["num_heads"]
    Dh = D * cfg["mlp_ratio"]
    blk = params["blocks"]
    bf16 = jnp.bfloat16
    nb = B // bb
    mlp_chunk = _choose_mlp_chunk(Dh)

    # pack small per-layer vectors into one (depth, 8, D) slab (one DMA/layer)
    zeros = jnp.zeros_like(blk["ln1_g"])
    vecs = jnp.concatenate([blk["ln1_g"], blk["ln1_b"], blk["proj_b"],
                            blk["ln2_g"], blk["ln2_b"], blk["fc2_b"],
                            zeros, zeros], axis=1)           # (depth, 8, D)

    kernel = functools.partial(vit_blocks_kernel, H, bb, L, mlp_chunk)

    dmap = lambda i, d: (d, 0, 0)        # per-layer stacked params
    cmap = lambda i, d: (0, 0)           # grid-invariant params
    bmap = lambda i, d: (i, 0)           # batch-tiled, constant over depth

    in_specs = [
        pl.BlockSpec((bb * L, D), bmap),                     # x0 (f32)
        pl.BlockSpec((1, 8, D), dmap),                       # packed vectors
        pl.BlockSpec((1, D, 3 * D), dmap),                   # qkv_w
        pl.BlockSpec((1, D, D), dmap),                       # proj_w
        pl.BlockSpec((1, D, Dh), dmap),                      # fc1_w
        pl.BlockSpec((1, 1, Dh), dmap),                      # fc1_b
        pl.BlockSpec((1, Dh, D), dmap),                      # fc2_w
        pl.BlockSpec((1, D), cmap),                          # norm_g
        pl.BlockSpec((1, D), cmap),                          # norm_b
    ]
    out_specs = pl.BlockSpec((bb * L, D), bmap)

    return pl.pallas_call(
        kernel,
        out_shape=jax.ShapeDtypeStruct((B * L, D), jnp.bfloat16),
        grid=(nb, depth),
        in_specs=in_specs,
        out_specs=out_specs,
        scratch_shapes=[pltpu.VMEM((bb * L, D), jnp.float32)],
        compiler_params=pltpu.CompilerParams(
            dimension_semantics=("parallel", "arbitrary"),
            vmem_limit_bytes=VMEM_LIMIT),
    )(x0_f32, vecs,
      blk["qkv_w"].astype(bf16), blk["proj_w"].astype(bf16),
      blk["fc1_w"].astype(bf16), blk["fc1_b"], blk["fc2_w"].astype(bf16),
      params["norm_g"], params["norm_b"])


def run_head(xf_bf16, params, cfg):
    B, K = xf_bf16.shape
    D = cfg["dim"]
    E = cfg["embedding_size"]
    bf16 = jnp.bfloat16
    w1 = params["feat_w1"].astype(bf16)

    # robust K tiling: bounded block size, pad K (zeros contribute nothing)
    kb = K if K <= 512 else 512
    Kp = ((K + kb - 1) // kb) * kb
    if Kp != K:
        xf_bf16 = jnp.pad(xf_bf16, ((0, 0), (0, Kp - K)))
        w1 = jnp.pad(w1, ((0, Kp - K), (0, 0)))
    nk = Kp // kb

    cmap = lambda k: (0, 0)
    return pl.pallas_call(
        head_kernel,
        out_shape=jax.ShapeDtypeStruct((B, E), jnp.float32),
        grid=(nk,),
        in_specs=[
            pl.BlockSpec((B, kb), lambda k: (0, k)),        # xf (K-tiled)
            pl.BlockSpec((kb, D), lambda k: (k, 0)),        # feat_w1 (K-tiled)
            pl.BlockSpec((1, D), cmap),                     # bn1 running mean
            pl.BlockSpec((1, D), cmap),                     # bn1 running var
            pl.BlockSpec((1, D), cmap),                     # bn1 gamma
            pl.BlockSpec((1, D), cmap),                     # bn1 beta
            pl.BlockSpec((D, E), cmap),                     # feat_w2
            pl.BlockSpec((1, E), cmap),                     # bn2 running mean
            pl.BlockSpec((1, E), cmap),                     # bn2 running var
            pl.BlockSpec((1, E), cmap),                     # bn2 gamma
            pl.BlockSpec((1, E), cmap),                     # bn2 beta
        ],
        out_specs=pl.BlockSpec((B, E), cmap),
        scratch_shapes=[pltpu.VMEM((B, D), jnp.float32)],
        compiler_params=pltpu.CompilerParams(
            dimension_semantics=("arbitrary",),
            vmem_limit_bytes=VMEM_LIMIT),
    )(xf_bf16, w1,
      params["bn1_mean"], params["bn1_var"], params["bn1_g"], params["bn1_b"],
      params["feat_w2"].astype(bf16),
      params["bn2_mean"], params["bn2_var"], params["bn2_g"], params["bn2_b"])


# ---------------------------------------------------------------------------
# Parameter construction (deterministic; matches module shapes / init)
# ---------------------------------------------------------------------------
def init_params(key, *, in_channels, patch_size, dim, depth, mlp_ratio,
                num_patches, embedding_size):
    keys = iter(jax.random.split(key, 16))

    def nrm(shape, std=0.02):
        return jax.random.normal(next(keys), shape, jnp.float32) * std

    K = in_channels * patch_size * patch_size
    hidden = dim * mlp_ratio
    params = {
        # conv weight reshaped to (C*p*p, dim) [matching (C, ph, pw) flatten]
        "patch_w": nrm((K, dim)),
        "patch_b": nrm((1, dim)),
        "pos_embed": nrm((num_patches, dim)),                 # (L, D)
        # per-block parameters stacked along depth for the fused grid
        "blocks": {
            "ln1_g": jnp.ones((depth, 1, dim), jnp.float32),
            "ln1_b": jnp.zeros((depth, 1, dim), jnp.float32),
            "qkv_w": nrm((depth, dim, 3 * dim)),              # no bias
            "proj_w": nrm((depth, dim, dim)),
            "proj_b": jnp.zeros((depth, 1, dim), jnp.float32),
            "ln2_g": jnp.ones((depth, 1, dim), jnp.float32),
            "ln2_b": jnp.zeros((depth, 1, dim), jnp.float32),
            "fc1_w": nrm((depth, dim, hidden)),
            "fc1_b": jnp.zeros((depth, 1, hidden), jnp.float32),
            "fc2_w": nrm((depth, hidden, dim)),
            "fc2_b": jnp.zeros((depth, 1, dim), jnp.float32),
        },
        "norm_g": jnp.ones((1, dim), jnp.float32),
        "norm_b": jnp.zeros((1, dim), jnp.float32),
        # feature head (Linear no-bias + BatchNorm1d eval-mode running stats)
        "feat_w1": nrm((dim * num_patches, dim)),
        "bn1_mean": jnp.zeros((1, dim), jnp.float32),
        "bn1_var": jnp.ones((1, dim), jnp.float32),
        "bn1_g": jnp.ones((1, dim), jnp.float32),
        "bn1_b": jnp.zeros((1, dim), jnp.float32),
        "feat_w2": nrm((dim, embedding_size)),
        "bn2_mean": jnp.zeros((1, embedding_size), jnp.float32),
        "bn2_var": jnp.ones((1, embedding_size), jnp.float32),
        "bn2_g": jnp.ones((1, embedding_size), jnp.float32),
        "bn2_b": jnp.zeros((1, embedding_size), jnp.float32),
    }
    return params


# ---------------------------------------------------------------------------
# Full forward
# ---------------------------------------------------------------------------
def vit_forward(x_nchw, params, cfg):
    B, C, Hh, Ww = x_nchw.shape
    p = cfg["patch_size"]
    D = cfg["dim"]
    Hp, Wp = Hh // p, Ww // p
    L = Hp * Wp
    assert L == cfg["num_patches"]

    # patch extraction (pure data movement) — layout plumbing in JAX glue
    patches = (x_nchw
               .reshape(B, C, Hp, p, Wp, p)
               .transpose(0, 2, 4, 1, 3, 5)
               .reshape(B * L, C * p * p)
               .astype(jnp.bfloat16))

    bb = _choose_batch_block(B, L, MAX_ROWS)
    x0 = run_patch_embed(patches, params, cfg, B=B, L=L, bb=bb)   # (B*L, D) f32
    xn = run_vit_blocks(x0, params, cfg, B=B, L=L, bb=bb)         # (B*L, D) bf16
    xf = xn.reshape(B, L * D)                                     # bf16 head input
    out = run_head(xf, params, cfg)                               # (B, E) f32
    return out


if __name__ == "__main__":
    cfg = dict(
        input_size=16,
        patch_size=8,
        in_channels=4,
        dim=32,
        embedding_size=32,
        depth=2,
        num_heads=4,
        mlp_ratio=4,
    )
    cfg["num_patches"] = (cfg["input_size"] // cfg["patch_size"]) ** 2  # = 4

    root = jax.random.PRNGKey(0)
    k_x, k_p = jax.random.split(root)

    x = jax.random.normal(
        k_x, (2, cfg["in_channels"], cfg["input_size"], cfg["input_size"]),
        jnp.float32)
    params = init_params(
        k_p,
        in_channels=cfg["in_channels"],
        patch_size=cfg["patch_size"],
        dim=cfg["dim"],
        depth=cfg["depth"],
        mlp_ratio=cfg["mlp_ratio"],
        num_patches=cfg["num_patches"],
        embedding_size=cfg["embedding_size"],
    )

    out = vit_forward(x, params, cfg)
    jax.block_until_ready(out)
    assert out.shape == (2, cfg["embedding_size"])
    assert bool(jnp.all(jnp.isfinite(out)))
    print("KERNEL_OK")
</pallas_src>

<mosaic_0001>
module attributes {stable_mosaic.version = 11 : i64} {
  func.func @patch_embed_kernel(%arg0: i32, %arg1: memref<8x256xbf16, #tpu.memory_space<vmem>>, %arg2: memref<256x32xbf16, #tpu.memory_space<vmem>>, %arg3: memref<1x32xf32, #tpu.memory_space<vmem>>, %arg4: memref<4x32xf32, #tpu.memory_space<vmem>>, %arg5: memref<8x32xf32, #tpu.memory_space<vmem>>) attributes {dimension_semantics = [#tpu.dimension_semantics<parallel>], iteration_bounds = array<i64: 1>, scalar_prefetch = 0 : i64, scratch_operands = 0 : i64, tpu.core_type = #tpu.core_type<tc>, window_params = [{transform_indices = @transform_0, window_bounds = array<i64: 8, 256>}, {pipeline_mode = #tpu.pipeline_mode<synchronous>, transform_indices = @transform_1, window_bounds = array<i64: 256, 32>}, {pipeline_mode = #tpu.pipeline_mode<synchronous>, transform_indices = @transform_2, window_bounds = array<i64: 1, 32>}, {pipeline_mode = #tpu.pipeline_mode<synchronous>, transform_indices = @transform_3, window_bounds = array<i64: 4, 32>}, {transform_indices = @transform_4, window_bounds = array<i64: 8, 32>}]} {
    %c0 = arith.constant 0 : index
    %c0_0 = arith.constant 0 : index
    %0 = vector.load %arg1[%c0, %c0_0] : memref<8x256xbf16, #tpu.memory_space<vmem>>, vector<8x256xbf16>
    %c0_1 = arith.constant 0 : index
    %c0_2 = arith.constant 0 : index
    %1 = vector.load %arg2[%c0_1, %c0_2] : memref<256x32xbf16, #tpu.memory_space<vmem>>, vector<256x32xbf16>
    %cst = arith.constant dense<0.000000e+00> : vector<8x32xf32>
    %2 = tpu.matmul %0, %1, %cst {dimension_numbers = #tpu.dot_dimension_numbers<[1], [0], [0], [1], [0, 0, 1, 1], [], []>} : vector<8x256xbf16>, vector<256x32xbf16>, vector<8x32xf32> -> vector<8x32xf32>
    %c0_3 = arith.constant 0 : index
    %c0_4 = arith.constant 0 : index
    %3 = vector.load %arg3[%c0_3, %c0_4] : memref<1x32xf32, #tpu.memory_space<vmem>>, vector<1x32xf32>
    %4 = vector.broadcast %3 : vector<1x32xf32> to vector<8x32xf32>
    %5 = arith.addf %2, %4 : vector<8x32xf32>
    %6 = vector.shape_cast %5 : vector<8x32xf32> to vector<2x4x32xf32>
    %c0_5 = arith.constant 0 : index
    %c0_6 = arith.constant 0 : index
    %7 = vector.load %arg4[%c0_5, %c0_6] : memref<4x32xf32, #tpu.memory_space<vmem>>, vector<4x32xf32>
    %8 = vector.shape_cast %7 : vector<4x32xf32> to vector<1x4x32xf32>
    %9 = vector.broadcast %8 : vector<1x4x32xf32> to vector<2x4x32xf32>
    %10 = arith.addf %6, %9 : vector<2x4x32xf32>
    %11 = vector.shape_cast %10 : vector<2x4x32xf32> to vector<8x32xf32>
    %c0_7 = arith.constant 0 : index
    %c0_8 = arith.constant 0 : index
    %12 = vector.load %arg5[%c0_7, %c0_8] : memref<8x32xf32, #tpu.memory_space<vmem>>, vector<8x32xf32>
    tpu.vector_store %arg5[%c0_7, %c0_8], %11 {strides = array<i32>} : memref<8x32xf32, #tpu.memory_space<vmem>>, vector<8x32xf32>,
    return
  }
  func.func @transform_0(%arg0: i32) -> (i32, i32) {
    %c0_i32 = arith.constant 0 : i32
    %c0_i32_0 = arith.constant 0 : i32
    return %arg0, %c0_i32 : i32, i32
  }
  func.func @transform_1(%arg0: i32) -> (i32, i32) {
    %c0_i32 = arith.constant 0 : i32
    %c0_i32_0 = arith.constant 0 : i32
    %c0_i32_1 = arith.constant 0 : i32
    return %c0_i32, %c0_i32_0 : i32, i32
  }
  func.func @transform_2(%arg0: i32) -> (i32, i32) {
    %c0_i32 = arith.constant 0 : i32
    %c0_i32_0 = arith.constant 0 : i32
    %c0_i32_1 = arith.constant 0 : i32
    return %c0_i32, %c0_i32_0 : i32, i32
  }
  func.func @transform_3(%arg0: i32) -> (i32, i32) {
    %c0_i32 = arith.constant 0 : i32
    %c0_i32_0 = arith.constant 0 : i32
    %c0_i32_1 = arith.constant 0 : i32
    return %c0_i32, %c0_i32_0 : i32, i32
  }
  func.func @transform_4(%arg0: i32) -> (i32, i32) {
    %c0_i32 = arith.constant 0 : i32
    %c0_i32_0 = arith.constant 0 : i32
    return %arg0, %c0_i32 : i32, i32
  }
}

</mosaic_0001>

<bundles_post_ra>
// kernel: tpu_custom_call.1
= control target key start
LH: loop header
LB: loop body
LE: loop exit
PB: predicated region body
PF: predicated region fallthrough
CT: control target
= control target key end

     0   :  { %s409_s0 = inlined_call_operand.vmem [shape: bf16[8,256], index: 0, kind: input, shape index: {}]   ;;  %s410_s1 = inlined_call_operand.vmem [shape: bf16[256,32], index: 1, kind: input, shape index: {}]   ;;  %s411_s2 = inlined_call_operand.vmem [shape: f32[1,32], index: 2, kind: input, shape index: {}]   ;;  %s412_s3 = inlined_call_operand.vmem [shape: f32[4,32], index: 3, kind: input, shape index: {}]   ;;  %s413_s4 = inlined_call_operand.hbm [shape: f32[8,32], index: 4, kind: output, shape index: {}]  }
   0x1   :  { %v286_v0 = vld [vmem:[%s410_s1 + $0x38] sm:$0xff]  ;;  %v285_v2 = vld [vmem:[%s410_s1 + $0x30] sm:$0xff]  ;;  %v284_v4 = vld [vmem:[%s410_s1 + $0x28] sm:$0xff] }
   0x2   :  { %v294_v1 = vld [vmem:[%s410_s1 + $0x78] sm:$0xff]  ;;  %158 = vmatpush.bf16.msra.mxu0 %v286_v0  ;;  %v293_v3 = vld [vmem:[%s410_s1 + $0x70] sm:$0xff]  ;;  %v292_v5 = vld [vmem:[%s410_s1 + $0x68] sm:$0xff] }
   0x3   :  { %171 = vmatpush.bf16.msra.mxu1 %v294_v1 }
   0x6   :  { %159 = vmatpush.bf16.msra.mxu0 %v285_v2 }
   0x7   :  { %172 = vmatpush.bf16.msra.mxu1 %v293_v3 }
   0x8   :  { %9 = vsyncpa [#allocation3], 0  ;;  %v283_v6 = vld [vmem:[%s410_s1 + $0x20] sm:$0xff]  ;;  %v282_v8 = vld [vmem:[%s410_s1 + $0x18] sm:$0xff]  ;;  %vm197_vm0 = vcmask 261120  }
   0x9   :  { %v291_v7 = vld [vmem:[%s410_s1 + $0x60] sm:$0xff]  ;;  %v290_v9 = vld [vmem:[%s410_s1 + $0x58] sm:$0xff]  ;;  %v281_v10 = vld [vmem:[%s410_s1 + $0x10] sm:$0xff] }
   0xa   :  { %160 = vmatpush.bf16.msra.mxu0 %v284_v4  ;;  %v289_v11 = vld [vmem:[%s410_s1 + $0x50] sm:$0xff]  ;;  %v280_v12 = vld [vmem:[%s410_s1 + $0x8] sm:$0xff]  ;;  %v18_v14 = vld [vmem:[%s409_s0] sm:$0xff] }
   0xb   :  { %173 = vmatpush.bf16.msra.mxu1 %v292_v5  ;;  %v288_v13 = vld [vmem:[%s410_s1 + $0x48] sm:$0xff]  ;;  %v56_v15 = vunpack.c.l.b16 %v18_v14  ;;  %v57_v16 = vunpack.c.h.b16 %v18_v14  ;;  %v279_v17 = vld [vmem:[%s410_s1] sm:$0xff] }
   0xc   :  { %v287_v18 = vld [vmem:[%s410_s1 + $0x40] sm:$0xff]  ;;  %s323_s1 = smov [#allocation2]  }
   0xd   :  { %v58_v19 = vpack.c.b16 %v56_v15, %v56_v15  ;;  %v59_v20 = vpack.c.b16 %v57_v16, %v57_v16  ;;  %v296_v21 = vld [vmem:[%s411_s2] ss:$0 sm:$0xff]  ;;  %s204_s26 = sshll.u32 %s323_s1, 4  ;;  %s206_s2 = sshll.u32 %s413_s4, 4  ;;  %s205_s26 = int_to_ptr.vmem [resolvable:$true] %s204_s26  ;;  %s207_s2 = int_to_ptr.hbm [resolvable:$true] %s206_s2 }
   0xe   :  { %161 = vmatpush.bf16.msra.mxu0 %v283_v6  ;;  %v187_v25 = vld [vmem:[%s412_s3] sm:$0xf] }
   0xf   :  { %174 = vmatpush.bf16.msra.mxu1 %v291_v7 }
  0x12   :  { %162 = vmatpush.bf16.msra.mxu0 %v282_v8 }
  0x13   :  { %175 = vmatpush.bf16.msra.mxu1 %v290_v9 }
  0x16   :  { %163 = vmatpush.bf16.msra.mxu0 %v281_v10 }
  0x17   :  { %176 = vmatpush.bf16.msra.mxu1 %v289_v11 }
  0x1a   :  { %164 = vmatpush.bf16.msra.mxu0 %v280_v12 }
  0x1b   :  { %177 = vmatpush.bf16.msra.mxu1 %v288_v13 }
  0x1e   :  { %165 = vmatpush.bf16.msra.mxu0 %v279_v17 }
  0x1f   :  { %178 = vmatpush.bf16.msra.mxu1 %v287_v18 }
  0x21   :  { %166 = vmatmul.bf16.vlgmr.msra.gmra.mxu0 %v58_v19 }
  0x22   :  { %179 = vmatmul.bf16.vlgmr.msra.gmra.mxu1 %v59_v20 }
  0x9e   :  { %v167_v22 = vpop.f32.mrf.mxu0 }
  0x9f   :  { %v180_v23 = vpop.f32.mrf.mxu1  ;;  %v168_v24 = vadd.f32 %v296_v21, %v167_v22 }
  0xa1   :  { %v181_v26 = vadd.f32 %v180_v23, %v168_v24 }
  0xa3   :  { %v185_v27 = vrot.slane %v181_v26, 4  ;;  %v188_v28 = vadd.f32 %v187_v25, %v181_v26 }
  0xa5   :  { %v189_v29 = vadd.f32 %v187_v25, %v185_v27  ;;  %192 = vst [vmem:[#allocation1] ss:$2 sm:$0xff] %v188_v28 }
  0xa6   :  { %v169_v30 = vpop.f32.mrf.mxu0 }
  0xa7   :  { %v182_v31 = vpop.f32.mrf.mxu1  ;;  %194 = vst [vmem:[#allocation1 + $0x1] ss:$2 sm:$0xff] %v189_v29 }
  0xae   :  { %v195_v32 = vld.sshfl [vmem:[#allocation1] sm:$0xff pattern:$0x75316420] }
  0xaf   :  { %198 = vst.msk [vmem:[#allocation2] sm:$0xff] %vm197_vm0, %v195_v32 }
  0xb0   :  { %209 = dma.vmem_to_hbm [thread:$0]  %s205_s26, 128, %s207_s2, [#allocation3]  }
  0xb1   :  { %321 = dma.done.wait [#allocation3], 128  }
  0xb2   :  { %322 = vsyncadd [#allocation3], 4294967168 }
  0xb3   :  { %214 = vsyncpa [#allocation3], 1 }

</bundles_post_ra>
